<compile_context>
chip_gen: v7x
topology: tpu7x:2x2x1
jax: 0.10.0
libtpu: 0.0.40
codegen_flags: <defaults>
</compile_context>

<pallas_src>
import functools

import jax
import jax.numpy as jnp
from jax.experimental import pallas as pl
from jax.experimental.pallas import tpu as pltpu


def _attention_kernel(x_ref, wqkv_ref, wout_ref, bout_ref, o_ref, *,
                      heads, dim_head, scale):
    """One batch element: fused QKV proj -> per-head softmax(QK^T)V -> out proj."""
    n = x_ref.shape[0]
    inner = heads * dim_head

    x = x_ref[...]                                                    # (n, dim)
    # Whole QKV projection in one MXU matmul (to_qkv has no bias).
    qkv = jnp.dot(x, wqkv_ref[...],
                  preferred_element_type=jnp.float32)                 # (n, 3*inner)

    wout = wout_ref[...]                                              # (inner, dim_p)
    acc = jnp.zeros((n, wout.shape[1]), jnp.float32)

    # Static (unrolled) loop over heads: small 2-D MXU work per head.
    for h in range(heads):
        s = h * dim_head
        qh = qkv[:, s:s + dim_head]                                   # (n, d)
        kh = qkv[:, inner + s:inner + s + dim_head]                   # (n, d)
        vh = qkv[:, 2 * inner + s:2 * inner + s + dim_head]           # (n, d)

        # sim = q @ k^T * scale (contract over d; no explicit transpose).
        sim = jax.lax.dot_general(
            qh, kh, (((1,), (1,)), ((), ())),
            preferred_element_type=jnp.float32) * scale               # (n, n)

        # Numerically-stable softmax along the last (lane) axis.
        m = jnp.max(sim, axis=-1, keepdims=True)
        p = jnp.exp(sim - m)
        denom = jnp.sum(p, axis=-1, keepdims=True)
        p = p * pl.reciprocal(denom, approx=True)                     # EUP recip

        oh = jnp.dot(p, vh, preferred_element_type=jnp.float32)       # (n, d)

        # rearrange('b h n d -> b n (h d)') followed by to_out is equivalent to
        # summing per-head contributions oh @ W_out[h*d:(h+1)*d, :].
        acc = acc + jnp.dot(oh, wout[s:s + dim_head, :],
                            preferred_element_type=jnp.float32)

    o_ref[...] = (acc + bout_ref[...]).astype(o_ref.dtype)


def attention_pallas(x, w_qkv, w_out, b_out, *, heads, dim_head):
    """x: (B, N, dim); w_qkv: (dim, 3*inner); w_out: (inner, dim); b_out: (dim,)."""
    B, N, dim = x.shape
    inner = heads * dim_head
    assert w_qkv.shape == (dim, 3 * inner)
    assert w_out.shape == (inner, dim)
    assert b_out.shape == (dim,)
    scale = dim_head ** -0.5

    # Lane-dense output: pad out-projection columns to a multiple of 128 so the
    # kernel stores full lanes (unmasked vst); slice the pad off afterwards.
    dim_p = max(128, ((dim + 127) // 128) * 128)
    if dim_p != dim:
        w_out_p = jnp.zeros((inner, dim_p), w_out.dtype).at[:, :dim].set(w_out)
        b_out_p = jnp.zeros((dim_p,), b_out.dtype).at[:dim].set(b_out)
    else:
        w_out_p, b_out_p = w_out, b_out
    b_out_2d = b_out_p.reshape(1, dim_p)

    kernel = functools.partial(_attention_kernel, heads=heads,
                               dim_head=dim_head, scale=scale)

    out_p = pl.pallas_call(
        kernel,
        out_shape=jax.ShapeDtypeStruct((B, N, dim_p), x.dtype),
        grid=(B,),
        in_specs=[
            # x: one batch element per grid step (batch dim squeezed out).
            pl.BlockSpec((None, N, dim), lambda b: (b, 0, 0)),
            # Weights / bias resident across the whole grid.
            pl.BlockSpec((dim, 3 * inner), lambda b: (0, 0)),
            pl.BlockSpec((inner, dim_p), lambda b: (0, 0)),
            pl.BlockSpec((1, dim_p), lambda b: (0, 0)),
        ],
        out_specs=pl.BlockSpec((None, N, dim_p), lambda b: (b, 0, 0)),
        compiler_params=pltpu.CompilerParams(
            # Batch elements are independent -> parallel (megacore on v7x).
            dimension_semantics=("parallel",)),
    )(x, w_qkv, w_out_p, b_out_2d)

    return out_p[..., :dim]


def attention_ref(x, w_qkv, w_out, b_out, *, heads, dim_head):
    """Plain-JAX reference identical to the PyTorch module's math."""
    B, N, dim = x.shape
    inner = heads * dim_head
    scale = dim_head ** -0.5
    qkv = x @ w_qkv                                         # (B, N, 3*inner)
    q, k, v = jnp.split(qkv, 3, axis=-1)

    def split_heads(t):
        return t.reshape(B, N, heads, dim_head).transpose(0, 2, 1, 3)

    q, k, v = map(split_heads, (q, k, v))                   # (B, H, N, d)
    sim = jnp.einsum('bhid,bhjd->bhij', q, k) * scale
    attn = jax.nn.softmax(sim, axis=-1)
    out = jnp.einsum('bhij,bhjd->bhid', attn, v)            # (B, H, N, d)
    out = out.transpose(0, 2, 1, 3).reshape(B, N, inner)
    return out @ w_out + b_out


if __name__ == "__main__":
    key = jax.random.PRNGKey(0)
    B, N, DIM = 2, 8, 32              # batch, sequence length, model dim
    HEADS, DIM_HEAD = 8, 16           # module defaults -> inner_dim = 128
    INNER = HEADS * DIM_HEAD

    kx, k1, k2, k3 = jax.random.split(key, 4)
    x = jax.random.normal(kx, (B, N, DIM), jnp.float32)
    # nn.Linear-style uniform init (weights stored transposed: (in, out)).
    bq = 1.0 / (DIM ** 0.5)
    bo = 1.0 / (INNER ** 0.5)
    w_qkv = jax.random.uniform(k1, (DIM, 3 * INNER), jnp.float32, -bq, bq)
    w_out = jax.random.uniform(k2, (INNER, DIM), jnp.float32, -bo, bo)
    b_out = jax.random.uniform(k3, (DIM,), jnp.float32, -bo, bo)

    # TODO(synk): nn.Dropout is defined in the module but never applied in its
    # forward (and rate defaults to 0.0), so it is intentionally omitted here.

    out = attention_pallas(x, w_qkv, w_out, b_out, heads=HEADS, dim_head=DIM_HEAD)
    out = jax.block_until_ready(out)

    ref = attention_ref(x, w_qkv, w_out, b_out, heads=HEADS, dim_head=DIM_HEAD)
    assert out.shape == (B, N, DIM)
    assert jnp.allclose(out, ref, atol=1e-2, rtol=1e-2), \
        float(jnp.max(jnp.abs(out - ref)))

    print("KERNEL_OK")
</pallas_src>

<mosaic_0001>
module attributes {stable_mosaic.version = 11 : i64} {
  func.func @_attention_kernel(%arg0: i32, %arg1: memref<1x8x32xf32, #tpu.memory_space<vmem>>, %arg2: memref<32x384xf32, #tpu.memory_space<vmem>>, %arg3: memref<128x128xf32, #tpu.memory_space<vmem>>, %arg4: memref<1x128xf32, #tpu.memory_space<vmem>>, %arg5: memref<1x8x128xf32, #tpu.memory_space<vmem>>) attributes {dimension_semantics = [#tpu.dimension_semantics<parallel>], iteration_bounds = array<i64: 2>, scalar_prefetch = 0 : i64, scratch_operands = 0 : i64, tpu.core_type = #tpu.core_type<tc>, window_params = [{transform_indices = @transform_0, window_bounds = array<i64: 1, 8, 32>}, {pipeline_mode = #tpu.pipeline_mode<synchronous>, transform_indices = @transform_1, window_bounds = array<i64: 32, 384>}, {pipeline_mode = #tpu.pipeline_mode<synchronous>, transform_indices = @transform_2, window_bounds = array<i64: 128, 128>}, {pipeline_mode = #tpu.pipeline_mode<synchronous>, transform_indices = @transform_3, window_bounds = array<i64: 1, 128>}, {transform_indices = @transform_4, window_bounds = array<i64: 1, 8, 128>}]} {
    %c0 = arith.constant 0 : index
    %c0_0 = arith.constant 0 : index
    %c0_1 = arith.constant 0 : index
    %0 = vector.load %arg1[%c0, %c0_0, %c0_1] : memref<1x8x32xf32, #tpu.memory_space<vmem>>, vector<1x8x32xf32>
    %1 = vector.shape_cast %0 : vector<1x8x32xf32> to vector<8x32xf32>
    %c0_2 = arith.constant 0 : index
    %c0_3 = arith.constant 0 : index
    %2 = vector.load %arg2[%c0_2, %c0_3] : memref<32x384xf32, #tpu.memory_space<vmem>>, vector<32x384xf32>
    %cst = arith.constant dense<0.000000e+00> : vector<8x384xf32>
    %3 = tpu.matmul %1, %2, %cst {dimension_numbers = #tpu.dot_dimension_numbers<[1], [0], [0], [1], [0, 0, 1, 1], [], []>} : vector<8x32xf32>, vector<32x384xf32>, vector<8x384xf32> -> vector<8x384xf32>
    %c0_4 = arith.constant 0 : index
    %c0_5 = arith.constant 0 : index
    %4 = vector.load %arg3[%c0_4, %c0_5] : memref<128x128xf32, #tpu.memory_space<vmem>>, vector<128x128xf32>
    %cst_6 = arith.constant 0.000000e+00 : f32
    %5 = vector.broadcast %cst_6 : f32 to vector<8x128xf32>
    %6 = vector.extract_strided_slice %3 {offsets = [0, 0], sizes = [8, 16], strides = [1, 1]} : vector<8x384xf32> to vector<8x16xf32>
    %7 = vector.extract_strided_slice %3 {offsets = [0, 128], sizes = [8, 16], strides = [1, 1]} : vector<8x384xf32> to vector<8x16xf32>
    %8 = vector.extract_strided_slice %3 {offsets = [0, 256], sizes = [8, 16], strides = [1, 1]} : vector<8x384xf32> to vector<8x16xf32>
    %cst_7 = arith.constant dense<0.000000e+00> : vector<8x8xf32>
    %9 = tpu.matmul %6, %7, %cst_7 {dimension_numbers = #tpu.dot_dimension_numbers<[1], [1], [0], [0], [0, 0, 1, 0], [], []>} : vector<8x16xf32>, vector<8x16xf32>, vector<8x8xf32> -> vector<8x8xf32>
    %cst_8 = arith.constant 2.500000e-01 : f32
    %10 = vector.broadcast %cst_8 : f32 to vector<8x8xf32>
    %11 = arith.mulf %9, %10 : vector<8x8xf32>
    %cst_9 = arith.constant dense<0xFF800000> : vector<8xf32>
    %12 = vector.multi_reduction <maximumf>, %11, %cst_9 [1] : vector<8x8xf32> to vector<8xf32>
    %13 = vector.shape_cast %12 : vector<8xf32> to vector<8x1xf32>
    %14 = vector.broadcast %13 : vector<8x1xf32> to vector<8x8xf32>
    %15 = arith.subf %11, %14 : vector<8x8xf32>
    %16 = math.exp %15 : vector<8x8xf32>
    %cst_10 = arith.constant dense<0.000000e+00> : vector<8xf32>
    %17 = vector.multi_reduction <add>, %16, %cst_10 [1] : vector<8x8xf32> to vector<8xf32>
    %18 = vector.shape_cast %17 : vector<8xf32> to vector<8x1xf32>
    %19 = tpu.reciprocal %18 {approx = true} : vector<8x1xf32> -> vector<8x1xf32>
    %20 = vector.broadcast %19 : vector<8x1xf32> to vector<8x8xf32>
    %21 = arith.mulf %16, %20 : vector<8x8xf32>
    %cst_11 = arith.constant dense<0.000000e+00> : vector<8x16xf32>
    %22 = tpu.matmul %21, %8, %cst_11 {dimension_numbers = #tpu.dot_dimension_numbers<[1], [0], [0], [1], [0, 0, 1, 1], [], []>} : vector<8x8xf32>, vector<8x16xf32>, vector<8x16xf32> -> vector<8x16xf32>
    %23 = vector.extract_strided_slice %4 {offsets = [0, 0], sizes = [16, 128], strides = [1, 1]} : vector<128x128xf32> to vector<16x128xf32>
    %cst_12 = arith.constant dense<0.000000e+00> : vector<8x128xf32>
    %24 = tpu.matmul %22, %23, %cst_12 {dimension_numbers = #tpu.dot_dimension_numbers<[1], [0], [0], [1], [0, 0, 1, 1], [], []>} : vector<8x16xf32>, vector<16x128xf32>, vector<8x128xf32> -> vector<8x128xf32>
    %25 = arith.addf %5, %24 : vector<8x128xf32>
    %26 = vector.extract_strided_slice %3 {offsets = [0, 16], sizes = [8, 16], strides = [1, 1]} : vector<8x384xf32> to vector<8x16xf32>
    %27 = vector.extract_strided_slice %3 {offsets = [0, 144], sizes = [8, 16], strides = [1, 1]} : vector<8x384xf32> to vector<8x16xf32>
    %28 = vector.extract_strided_slice %3 {offsets = [0, 272], sizes = [8, 16], strides = [1, 1]} : vector<8x384xf32> to vector<8x16xf32>
    %cst_13 = arith.constant dense<0.000000e+00> : vector<8x8xf32>
    %29 = tpu.matmul %26, %27, %cst_13 {dimension_numbers = #tpu.dot_dimension_numbers<[1], [1], [0], [0], [0, 0, 1, 0], [], []>} : vector<8x16xf32>, vector<8x16xf32>, vector<8x8xf32> -> vector<8x8xf32>
    %cst_14 = arith.constant 2.500000e-01 : f32
    %30 = vector.broadcast %cst_14 : f32 to vector<8x8xf32>
    %31 = arith.mulf %29, %30 : vector<8x8xf32>
    %cst_15 = arith.constant dense<0xFF800000> : vector<8xf32>
    %32 = vector.multi_reduction <maximumf>, %31, %cst_15 [1] : vector<8x8xf32> to vector<8xf32>
    %33 = vector.shape_cast %32 : vector<8xf32> to vector<8x1xf32>
    %34 = vector.broadcast %33 : vector<8x1xf32> to vector<8x8xf32>
    %35 = arith.subf %31, %34 : vector<8x8xf32>
    %36 = math.exp %35 : vector<8x8xf32>
    %cst_16 = arith.constant dense<0.000000e+00> : vector<8xf32>
    %37 = vector.multi_reduction <add>, %36, %cst_16 [1] : vector<8x8xf32> to vector<8xf32>
    %38 = vector.shape_cast %37 : vector<8xf32> to vector<8x1xf32>
    %39 = tpu.reciprocal %38 {approx = true} : vector<8x1xf32> -> vector<8x1xf32>
    %40 = vector.broadcast %39 : vector<8x1xf32> to vector<8x8xf32>
    %41 = arith.mulf %36, %40 : vector<8x8xf32>
    %cst_17 = arith.constant dense<0.000000e+00> : vector<8x16xf32>
    %42 = tpu.matmul %41, %28, %cst_17 {dimension_numbers = #tpu.dot_dimension_numbers<[1], [0], [0], [1], [0, 0, 1, 1], [], []>} : vector<8x8xf32>, vector<8x16xf32>, vector<8x16xf32> -> vector<8x16xf32>
    %43 = vector.extract_strided_slice %4 {offsets = [16, 0], sizes = [16, 128], strides = [1, 1]} : vector<128x128xf32> to vector<16x128xf32>
    %cst_18 = arith.constant dense<0.000000e+00> : vector<8x128xf32>
    %44 = tpu.matmul %42, %43, %cst_18 {dimension_numbers = #tpu.dot_dimension_numbers<[1], [0], [0], [1], [0, 0, 1, 1], [], []>} : vector<8x16xf32>, vector<16x128xf32>, vector<8x128xf32> -> vector<8x128xf32>
    %45 = arith.addf %25, %44 : vector<8x128xf32>
    %46 = vector.extract_strided_slice %3 {offsets = [0, 32], sizes = [8, 16], strides = [1, 1]} : vector<8x384xf32> to vector<8x16xf32>
    %47 = vector.extract_strided_slice %3 {offsets = [0, 160], sizes = [8, 16], strides = [1, 1]} : vector<8x384xf32> to vector<8x16xf32>
    %48 = vector.extract_strided_slice %3 {offsets = [0, 288], sizes = [8, 16], strides = [1, 1]} : vector<8x384xf32> to vector<8x16xf32>
    %cst_19 = arith.constant dense<0.000000e+00> : vector<8x8xf32>
    %49 = tpu.matmul %46, %47, %cst_19 {dimension_numbers = #tpu.dot_dimension_numbers<[1], [1], [0], [0], [0, 0, 1, 0], [], []>} : vector<8x16xf32>, vector<8x16xf32>, vector<8x8xf32> -> vector<8x8xf32>
    %cst_20 = arith.constant 2.500000e-01 : f32
    %50 = vector.broadcast %cst_20 : f32 to vector<8x8xf32>
    %51 = arith.mulf %49, %50 : vector<8x8xf32>
    %cst_21 = arith.constant dense<0xFF800000> : vector<8xf32>
    %52 = vector.multi_reduction <maximumf>, %51, %cst_21 [1] : vector<8x8xf32> to vector<8xf32>
    %53 = vector.shape_cast %52 : vector<8xf32> to vector<8x1xf32>
    %54 = vector.broadcast %53 : vector<8x1xf32> to vector<8x8xf32>
    %55 = arith.subf %51, %54 : vector<8x8xf32>
    %56 = math.exp %55 : vector<8x8xf32>
    %cst_22 = arith.constant dense<0.000000e+00> : vector<8xf32>
    %57 = vector.multi_reduction <add>, %56, %cst_22 [1] : vector<8x8xf32> to vector<8xf32>
    %58 = vector.shape_cast %57 : vector<8xf32> to vector<8x1xf32>
    %59 = tpu.reciprocal %58 {approx = true} : vector<8x1xf32> -> vector<8x1xf32>
    %60 = vector.broadcast %59 : vector<8x1xf32> to vector<8x8xf32>
    %61 = arith.mulf %56, %60 : vector<8x8xf32>
    %cst_23 = arith.constant dense<0.000000e+00> : vector<8x16xf32>
    %62 = tpu.matmul %61, %48, %cst_23 {dimension_numbers = #tpu.dot_dimension_numbers<[1], [0], [0], [1], [0, 0, 1, 1], [], []>} : vector<8x8xf32>, vector<8x16xf32>, vector<8x16xf32> -> vector<8x16xf32>
    %63 = vector.extract_strided_slice %4 {offsets = [32, 0], sizes = [16, 128], strides = [1, 1]} : vector<128x128xf32> to vector<16x128xf32>
    %cst_24 = arith.constant dense<0.000000e+00> : vector<8x128xf32>
    %64 = tpu.matmul %62, %63, %cst_24 {dimension_numbers = #tpu.dot_dimension_numbers<[1], [0], [0], [1], [0, 0, 1, 1], [], []>} : vector<8x16xf32>, vector<16x128xf32>, vector<8x128xf32> -> vector<8x128xf32>
    %65 = arith.addf %45, %64 : vector<8x128xf32>
    %66 = vector.extract_strided_slice %3 {offsets = [0, 48], sizes = [8, 16], strides = [1, 1]} : vector<8x384xf32> to vector<8x16xf32>
    %67 = vector.extract_strided_slice %3 {offsets = [0, 176], sizes = [8, 16], strides = [1, 1]} : vector<8x384xf32> to vector<8x16xf32>
    %68 = vector.extract_strided_slice %3 {offsets = [0, 304], sizes = [8, 16], strides = [1, 1]} : vector<8x384xf32> to vector<8x16xf32>
    %cst_25 = arith.constant dense<0.000000e+00> : vector<8x8xf32>
    %69 = tpu.matmul %66, %67, %cst_25 {dimension_numbers = #tpu.dot_dimension_numbers<[1], [1], [0], [0], [0, 0, 1, 0], [], []>} : vector<8x16xf32>, vector<8x16xf32>, vector<8x8xf32> -> vector<8x8xf32>
    %cst_26 = arith.constant 2.500000e-01 : f32
    %70 = vector.broadcast %cst_26 : f32 to vector<8x8xf32>
    %71 = arith.mulf %69, %70 : vector<8x8xf32>
    %cst_27 = arith.constant dense<0xFF800000> : vector<8xf32>
    %72 = vector.multi_reduction <maximumf>, %71, %cst_27 [1] : vector<8x8xf32> to vector<8xf32>
    %73 = vector.shape_cast %72 : vector<8xf32> to vector<8x1xf32>
    %74 = vector.broadcast %73 : vector<8x1xf32> to vector<8x8xf32>
    %75 = arith.subf %71, %74 : vector<8x8xf32>
    %76 = math.exp %75 : vector<8x8xf32>
    %cst_28 = arith.constant dense<0.000000e+00> : vector<8xf32>
    %77 = vector.multi_reduction <add>, %76, %cst_28 [1] : vector<8x8xf32> to vector<8xf32>
    %78 = vector.shape_cast %77 : vector<8xf32> to vector<8x1xf32>
    %79 = tpu.reciprocal %78 {approx = true} : vector<8x1xf32> -> vector<8x1xf32>
    %80 = vector.broadcast %79 : vector<8x1xf32> to vector<8x8xf32>
    %81 = arith.mulf %76, %80 : vector<8x8xf32>
    %cst_29 = arith.constant dense<0.000000e+00> : vector<8x16xf32>
    %82 = tpu.matmul %81, %68, %cst_29 {dimension_numbers = #tpu.dot_dimension_numbers<[1], [0], [0], [1], [0, 0, 1, 1], [], []>} : vector<8x8xf32>, vector<8x16xf32>, vector<8x16xf32> -> vector<8x16xf32>
    %83 = vector.extract_strided_slice %4 {offsets = [48, 0], sizes = [16, 128], strides = [1, 1]} : vector<128x128xf32> to vector<16x128xf32>
    %cst_30 = arith.constant dense<0.000000e+00> : vector<8x128xf32>
    %84 = tpu.matmul %82, %83, %cst_30 {dimension_numbers = #tpu.dot_dimension_numbers<[1], [0], [0], [1], [0, 0, 1, 1], [], []>} : vector<8x16xf32>, vector<16x128xf32>, vector<8x128xf32> -> vector<8x128xf32>
    %85 = arith.addf %65, %84 : vector<8x128xf32>
    %86 = vector.extract_strided_slice %3 {offsets = [0, 64], sizes = [8, 16], strides = [1, 1]} : vector<8x384xf32> to vector<8x16xf32>
    %87 = vector.extract_strided_slice %3 {offsets = [0, 192], sizes = [8, 16], strides = [1, 1]} : vector<8x384xf32> to vector<8x16xf32>
    %88 = vector.extract_strided_slice %3 {offsets = [0, 320], sizes = [8, 16], strides = [1, 1]} : vector<8x384xf32> to vector<8x16xf32>
    %cst_31 = arith.constant dense<0.000000e+00> : vector<8x8xf32>
    %89 = tpu.matmul %86, %87, %cst_31 {dimension_numbers = #tpu.dot_dimension_numbers<[1], [1], [0], [0], [0, 0, 1, 0], [], []>} : vector<8x16xf32>, vector<8x16xf32>, vector<8x8xf32> -> vector<8x8xf32>
    %cst_32 = arith.constant 2.500000e-01 : f32
    %90 = vector.broadcast %cst_32 : f32 to vector<8x8xf32>
    %91 = arith.mulf %89, %90 : vector<8x8xf32>
    %cst_33 = arith.constant dense<0xFF800000> : vector<8xf32>
    %92 = vector.multi_reduction <maximumf>, %91, %cst_33 [1] : vector<8x8xf32> to vector<8xf32>
    %93 = vector.shape_cast %92 : vector<8xf32> to vector<8x1xf32>
    %94 = vector.broadcast %93 : vector<8x1xf32> to vector<8x8xf32>
    %95 = arith.subf %91, %94 : vector<8x8xf32>
    %96 = math.exp %95 : vector<8x8xf32>
    %cst_34 = arith.constant dense<0.000000e+00> : vector<8xf32>
    %97 = vector.multi_reduction <add>, %96, %cst_34 [1] : vector<8x8xf32> to vector<8xf32>
    %98 = vector.shape_cast %97 : vector<8xf32> to vector<8x1xf32>
    %99 = tpu.reciprocal %98 {approx = true} : vector<8x1xf32> -> vector<8x1xf32>
    %100 = vector.broadcast %99 : vector<8x1xf32> to vector<8x8xf32>
    %101 = arith.mulf %96, %100 : vector<8x8xf32>
    %cst_35 = arith.constant dense<0.000000e+00> : vector<8x16xf32>
    %102 = tpu.matmul %101, %88, %cst_35 {dimension_numbers = #tpu.dot_dimension_numbers<[1], [0], [0], [1], [0, 0, 1, 1], [], []>} : vector<8x8xf32>, vector<8x16xf32>, vector<8x16xf32> -> vector<8x16xf32>
    %103 = vector.extract_strided_slice %4 {offsets = [64, 0], sizes = [16, 128], strides = [1, 1]} : vector<128x128xf32> to vector<16x128xf32>
    %cst_36 = arith.constant dense<0.000000e+00> : vector<8x128xf32>
    %104 = tpu.matmul %102, %103, %cst_36 {dimension_numbers = #tpu.dot_dimension_numbers<[1], [0], [0], [1], [0, 0, 1, 1], [], []>} : vector<8x16xf32>, vector<16x128xf32>, vector<8x128xf32> -> vector<8x128xf32>
    %105 = arith.addf %85, %104 : vector<8x128xf32>
    %106 = vector.extract_strided_slice %3 {offsets = [0, 80], sizes = [8, 16], strides = [1, 1]} : vector<8x384xf32> to vector<8x16xf32>
    %107 = vector.extract_strided_slice %3 {offsets = [0, 208], sizes = [8, 16], strides = [1, 1]} : vector<8x384xf32> to vector<8x16xf32>
    %108 = vector.extract_strided_slice %3 {offsets = [0, 336], sizes = [8, 16], strides = [1, 1]} : vector<8x384xf32> to vector<8x16xf32>
    %cst_37 = arith.constant dense<0.000000e+00> : vector<8x8xf32>
    %109 = tpu.matmul %106, %107, %cst_37 {dimension_numbers = #tpu.dot_dimension_numbers<[1], [1], [0], [0], [0, 0, 1, 0], [], []>} : vector<8x16xf32>, vector<8x16xf32>, vector<8x8xf32> -> vector<8x8xf32>
    %cst_38 = arith.constant 2.500000e-01 : f32
    %110 = vector.broadcast %cst_38 : f32 to vector<8x8xf32>
    %111 = arith.mulf %109, %110 : vector<8x8xf32>
    %cst_39 = arith.constant dense<0xFF800000> : vector<8xf32>
    %112 = vector.multi_reduction <maximumf>, %111, %cst_39 [1] : vector<8x8xf32> to vector<8xf32>
    %113 = vector.shape_cast %112 : vector<8xf32> to vector<8x1xf32>
    %114 = vector.broadcast %113 : vector<8x1xf32> to vector<8x8xf32>
    %115 = arith.subf %111, %114 : vector<8x8xf32>
    %116 = math.exp %115 : vector<8x8xf32>
    %cst_40 = arith.constant dense<0.000000e+00> : vector<8xf32>
    %117 = vector.multi_reduction <add>, %116, %cst_40 [1] : vector<8x8xf32> to vector<8xf32>
    %118 = vector.shape_cast %117 : vector<8xf32> to vector<8x1xf32>
    %119 = tpu.reciprocal %118 {approx = true} : vector<8x1xf32> -> vector<8x1xf32>
    %120 = vector.broadcast %119 : vector<8x1xf32> to vector<8x8xf32>
    %121 = arith.mulf %116, %120 : vector<8x8xf32>
    %cst_41 = arith.constant dense<0.000000e+00> : vector<8x16xf32>
    %122 = tpu.matmul %121, %108, %cst_41 {dimension_numbers = #tpu.dot_dimension_numbers<[1], [0], [0], [1], [0, 0, 1, 1], [], []>} : vector<8x8xf32>, vector<8x16xf32>, vector<8x16xf32> -> vector<8x16xf32>
    %123 = vector.extract_strided_slice %4 {offsets = [80, 0], sizes = [16, 128], strides = [1, 1]} : vector<128x128xf32> to vector<16x128xf32>
    %cst_42 = arith.constant dense<0.000000e+00> : vector<8x128xf32>
    %124 = tpu.matmul %122, %123, %cst_42 {dimension_numbers = #tpu.dot_dimension_numbers<[1], [0], [0], [1], [0, 0, 1, 1], [], []>} : vector<8x16xf32>, vector<16x128xf32>, vector<8x128xf32> -> vector<8x128xf32>
    %125 = arith.addf %105, %124 : vector<8x128xf32>
    %126 = vector.extract_strided_slice %3 {offsets = [0, 96], sizes = [8, 16], strides = [1, 1]} : vector<8x384xf32> to vector<8x16xf32>
    %127 = vector.extract_strided_slice %3 {offsets = [0, 224], sizes = [8, 16], strides = [1, 1]} : vector<8x384xf32> to vector<8x16xf32>
    %128 = vector.extract_strided_slice %3 {offsets = [0, 352], sizes = [8, 16], strides = [1, 1]} : vector<8x384xf32> to vector<8x16xf32>
    %cst_43 = arith.constant dense<0.000000e+00> : vector<8x8xf32>
    %129 = tpu.matmul %126, %127, %cst_43 {dimension_numbers = #tpu.dot_dimension_numbers<[1], [1], [0], [0], [0, 0, 1, 0], [], []>} : vector<8x16xf32>, vector<8x16xf32>, vector<8x8xf32> -> vector<8x8xf32>
    %cst_44 = arith.constant 2.500000e-01 : f32
    %130 = vector.broadcast %cst_44 : f32 to vector<8x8xf32>
    %131 = arith.mulf %129, %130 : vector<8x8xf32>
    %cst_45 = arith.constant dense<0xFF800000> : vector<8xf32>
    %132 = vector.multi_reduction <maximumf>, %131, %cst_45 [1] : vector<8x8xf32> to vector<8xf32>
    %133 = vector.shape_cast %132 : vector<8xf32> to vector<8x1xf32>
    %134 = vector.broadcast %133 : vector<8x1xf32> to vector<8x8xf32>
    %135 = arith.subf %131, %134 : vector<8x8xf32>
    %136 = math.exp %135 : vector<8x8xf32>
    %cst_46 = arith.constant dense<0.000000e+00> : vector<8xf32>
    %137 = vector.multi_reduction <add>, %136, %cst_46 [1] : vector<8x8xf32> to vector<8xf32>
    %138 = vector.shape_cast %137 : vector<8xf32> to vector<8x1xf32>
    %139 = tpu.reciprocal %138 {approx = true} : vector<8x1xf32> -> vector<8x1xf32>
    %140 = vector.broadcast %139 : vector<8x1xf32> to vector<8x8xf32>
    %141 = arith.mulf %136, %140 : vector<8x8xf32>
    %cst_47 = arith.constant dense<0.000000e+00> : vector<8x16xf32>
    %142 = tpu.matmul %141, %128, %cst_47 {dimension_numbers = #tpu.dot_dimension_numbers<[1], [0], [0], [1], [0, 0, 1, 1], [], []>} : vector<8x8xf32>, vector<8x16xf32>, vector<8x16xf32> -> vector<8x16xf32>
    %143 = vector.extract_strided_slice %4 {offsets = [96, 0], sizes = [16, 128], strides = [1, 1]} : vector<128x128xf32> to vector<16x128xf32>
    %cst_48 = arith.constant dense<0.000000e+00> : vector<8x128xf32>
    %144 = tpu.matmul %142, %143, %cst_48 {dimension_numbers = #tpu.dot_dimension_numbers<[1], [0], [0], [1], [0, 0, 1, 1], [], []>} : vector<8x16xf32>, vector<16x128xf32>, vector<8x128xf32> -> vector<8x128xf32>
    %145 = arith.addf %125, %144 : vector<8x128xf32>
    %146 = vector.extract_strided_slice %3 {offsets = [0, 112], sizes = [8, 16], strides = [1, 1]} : vector<8x384xf32> to vector<8x16xf32>
    %147 = vector.extract_strided_slice %3 {offsets = [0, 240], sizes = [8, 16], strides = [1, 1]} : vector<8x384xf32> to vector<8x16xf32>
    %148 = vector.extract_strided_slice %3 {offsets = [0, 368], sizes = [8, 16], strides = [1, 1]} : vector<8x384xf32> to vector<8x16xf32>
    %cst_49 = arith.constant dense<0.000000e+00> : vector<8x8xf32>
    %149 = tpu.matmul %146, %147, %cst_49 {dimension_numbers = #tpu.dot_dimension_numbers<[1], [1], [0], [0], [0, 0, 1, 0], [], []>} : vector<8x16xf32>, vector<8x16xf32>, vector<8x8xf32> -> vector<8x8xf32>
    %cst_50 = arith.constant 2.500000e-01 : f32
    %150 = vector.broadcast %cst_50 : f32 to vector<8x8xf32>
    %151 = arith.mulf %149, %150 : vector<8x8xf32>
    %cst_51 = arith.constant dense<0xFF800000> : vector<8xf32>
    %152 = vector.multi_reduction <maximumf>, %151, %cst_51 [1] : vector<8x8xf32> to vector<8xf32>
    %153 = vector.shape_cast %152 : vector<8xf32> to vector<8x1xf32>
    %154 = vector.broadcast %153 : vector<8x1xf32> to vector<8x8xf32>
    %155 = arith.subf %151, %154 : vector<8x8xf32>
    %156 = math.exp %155 : vector<8x8xf32>
    %cst_52 = arith.constant dense<0.000000e+00> : vector<8xf32>
    %157 = vector.multi_reduction <add>, %156, %cst_52 [1] : vector<8x8xf32> to vector<8xf32>
    %158 = vector.shape_cast %157 : vector<8xf32> to vector<8x1xf32>
    %159 = tpu.reciprocal %158 {approx = true} : vector<8x1xf32> -> vector<8x1xf32>
    %160 = vector.broadcast %159 : vector<8x1xf32> to vector<8x8xf32>
    %161 = arith.mulf %156, %160 : vector<8x8xf32>
    %cst_53 = arith.constant dense<0.000000e+00> : vector<8x16xf32>
    %162 = tpu.matmul %161, %148, %cst_53 {dimension_numbers = #tpu.dot_dimension_numbers<[1], [0], [0], [1], [0, 0, 1, 1], [], []>} : vector<8x8xf32>, vector<8x16xf32>, vector<8x16xf32> -> vector<8x16xf32>
    %163 = vector.extract_strided_slice %4 {offsets = [112, 0], sizes = [16, 128], strides = [1, 1]} : vector<128x128xf32> to vector<16x128xf32>
    %cst_54 = arith.constant dense<0.000000e+00> : vector<8x128xf32>
    %164 = tpu.matmul %162, %163, %cst_54 {dimension_numbers = #tpu.dot_dimension_numbers<[1], [0], [0], [1], [0, 0, 1, 1], [], []>} : vector<8x16xf32>, vector<16x128xf32>, vector<8x128xf32> -> vector<8x128xf32>
    %165 = arith.addf %145, %164 : vector<8x128xf32>
    %c0_55 = arith.constant 0 : index
    %c0_56 = arith.constant 0 : index
    %166 = vector.load %arg4[%c0_55, %c0_56] : memref<1x128xf32, #tpu.memory_space<vmem>>, vector<1x128xf32>
    %167 = vector.broadcast %166 : vector<1x128xf32> to vector<8x128xf32>
    %168 = arith.addf %165, %167 : vector<8x128xf32>
    %c0_57 = arith.constant 0 : index
    %c0_58 = arith.constant 0 : index
    %c0_59 = arith.constant 0 : index
    %169 = vector.load %arg5[%c0_57, %c0_58, %c0_59] : memref<1x8x128xf32, #tpu.memory_space<vmem>>, vector<1x8x128xf32>
    %170 = vector.shape_cast %169 : vector<1x8x128xf32> to vector<8x128xf32>
    %171 = vector.shape_cast %168 : vector<8x128xf32> to vector<1x8x128xf32>
    tpu.vector_store %arg5[%c0_57, %c0_58, %c0_59], %171 {strides = array<i32>} : memref<1x8x128xf32, #tpu.memory_space<vmem>>, vector<1x8x128xf32>,
    return
  }
  func.func @transform_0(%arg0: i32) -> (i32, i32, i32) {
    %c0_i32 = arith.constant 0 : i32
    %c0_i32_0 = arith.constant 0 : i32
    %c0_i32_1 = arith.constant 0 : i32
    return %arg0, %c0_i32, %c0_i32_0 : i32, i32, i32
  }
  func.func @transform_1(%arg0: i32) -> (i32, i32) {
    %c0_i32 = arith.constant 0 : i32
    %c0_i32_0 = arith.constant 0 : i32
    %c0_i32_1 = arith.constant 0 : i32
    return %c0_i32, %c0_i32_0 : i32, i32
  }
  func.func @transform_2(%arg0: i32) -> (i32, i32) {
    %c0_i32 = arith.constant 0 : i32
    %c0_i32_0 = arith.constant 0 : i32
    %c0_i32_1 = arith.constant 0 : i32
    return %c0_i32, %c0_i32_0 : i32, i32
  }
  func.func @transform_3(%arg0: i32) -> (i32, i32) {
    %c0_i32 = arith.constant 0 : i32
    %c0_i32_0 = arith.constant 0 : i32
    %c0_i32_1 = arith.constant 0 : i32
    return %c0_i32, %c0_i32_0 : i32, i32
  }
  func.func @transform_4(%arg0: i32) -> (i32, i32, i32) {
    %c0_i32 = arith.constant 0 : i32
    %c0_i32_0 = arith.constant 0 : i32
    %c0_i32_1 = arith.constant 0 : i32
    return %arg0, %c0_i32, %c0_i32_0 : i32, i32, i32
  }
}

</mosaic_0001>

<bundles_post_ra>
// kernel: tpu_custom_call.1
= control target key start
LH: loop header
LB: loop body
LE: loop exit
PB: predicated region body
PF: predicated region fallthrough
CT: control target
= control target key end

     0   :  { %9 = vsyncpa [#allocation3], 0  ;;  %s3469_s0 = inlined_call_operand.hbm [shape: f32[2,8,32], index: 0, kind: input, shape index: {}]   ;;  %s3470_s1 = inlined_call_operand.hbm [shape: f32[32,384], index: 1, kind: input, shape index: {}]   ;;  %s3471_s2 = inlined_call_operand.hbm [shape: f32[128,128], index: 2, kind: input, shape index: {}]   ;;  %s3472_s3 = inlined_call_operand.vmem [shape: f32[1,128], index: 3, kind: input, shape index: {}]   ;;  %s3473_s4 = inlined_call_operand.hbm [shape: f32[2,8,128], index: 4, kind: output, shape index: {}]  }
   0x1   :  { %11 = vsyncpa [#allocation3 + $0x1], 0 }
   0x2   :  { %12 = vsyncpa [#allocation6], 0 }
   0x3   :  { %13 = vsyncpa [#allocation4], 0 }
   0x4   :  { %15 = vsyncpa [#allocation4 + $0x1], 0  ;;  %s3055_s15 = smov 0   ;;  %s3057_s16 = smov 0  }
   0x5   :  { %s3059_s17 = smov 0   ;;  %s3061_s18 = smov 0  }
   0x6 LB: > { %s3076_s19 = sadd.s32 4294967295, %s3010_s18   ;;  %s2444_s20 = sadd.s32 4294967294, %s3010_s18   ;;  %s3010_s18 = sphi %s3061_s18, %s3493_s18   ;;  %s3006_s17 = sphi %s3059_s17, %s3492_s17   ;;  %s3002_s16 = sphi %s3057_s16, %s3491_s16   ;;  %s2998_s15 = sphi %s3055_s15, %s3490_s15  }
   0x7   : > { %p41_p0 = scmp.ne.s32.totalorder %s3002_s16, %s2998_s15  ;;  %p3474_p1 = scmp.eq.s32.totalorder %s3076_s19, 0 }
   0x8   : > { %p134_p3 = scmp.eq.s32.totalorder %s2444_s20, 1  ;;  %p2445_p5 = scmp.ge.s32.totalorder %s3010_s18, 1 }
   0x9   : > { %p3085_p4 = por %p3474_p1, %p41_p0  ;;  %p141_p7 = scmp.lt.s32.totalorder %s3010_s18, 3 }
   0xa   : > { %p3090_p6 = por %p134_p3, %p41_p0  ;;  %s3012_s24 = smov [#allocation5]  }
   0xb   : > { %s3477_s21 = scalar_select %p3085_p4, 1, 0 }
   0xc   : > { %s3478_s22 = scalar_select %p3090_p6, 1, 0 }
   0xd   : > { %p3095_p8 = pnand %p2445_p5, %p141_p7  ;;  %s153_s25 = sshll.u32 %s3012_s24, 4  ;;  %s3099_s25 = int_to_ptr.vmem [resolvable:$true] %s153_s25 }
   0xe   : > { %s3013_s27 = smov [#allocation7]   ;;  %s2854_s5 = scalar_lea.hbm %s3470_s1, 1536 }
   0xf   : > { %p2753_p9 = pneg %p3095_p8  ;;  %s166_s28 = sshll.u32 %s3013_s27, 4  ;;  %s3110_s28 = int_to_ptr.vmem [resolvable:$true] %s166_s28 }
  0x10   : > { %p2855_p12 = scmp.ne.s32.totalorder %s3470_s1, %s2854_s5  ;;  %p2861_p5 = scmp.lt.u32.totalorder %s2854_s5, %s3470_s1 }
  0x11   : > { %p3106_p11 = pnand %p2753_p9, %p3474_p1 }
  0x13   : > { %p2856_p13 = pneg %p3106_p11 }
  0x15   : > { %p2857_p0 = pnand %p2856_p13, %p2855_p12 }
  0x17   : > { %p2858_p3 = pneg %p2857_p0 }
  0x19   : > { %p2863_p7 = pnand %p2861_p5, %p2858_p3 }
  0x1b   : > { %2866 = shalt.err (!%p2863_p7)
}
  0x1c   : > { %s2867_s10 = scalar_lea.vmem %s3099_s25, 1536  ;;  %p2875_p2 = scmp.lt.s32.totalorder %s3099_s25, %s3099_s25 }
  0x1d   : > { %p2868_p9 = scmp.ne.s32.totalorder %s3099_s25, %s2867_s10  ;;  %p2876_p12 = scmp.lt.s32.totalorder %s2867_s10, %s2867_s10 }
  0x1f   : > { %p2870_p10 = pnand %p2868_p9, %p2856_p13  ;;  %p2877_p0 = por %p2876_p12, %p2875_p2 }
  0x21   : > { %p2871_p1 = pneg %p2870_p10 }
  0x23   : > { %p2878_p6 = pnand %p2877_p0, %p2871_p1 }
  0x25   : > { %2881 = shalt.err (!%p2878_p6)
}
  0x26   : > { %s3014_s11 = smov 384   ;;  %s3015_s12 = smov 24  }
  0x27   : > { %2756 = dma.hbm_to_vmem [thread:$0]  (!%p3106_p11), %s3470_s1, 1536, %s3099_s25, [#allocation6], %s3014_s11, %s3014_s11, %s3015_s12  }
  0x28   : > { %s2882_s27 = scalar_lea.hbm %s3471_s2, 2048 }
  0x29   : > { %p2883_p2 = scmp.ne.s32.totalorder %s3471_s2, %s2882_s27  ;;  %p2889_p10 = scmp.lt.u32.totalorder %s2882_s27, %s3471_s2 }
  0x2b   : > { %p2885_p1 = pnand %p2883_p2, %p2856_p13 }
  0x2d   : > { %p2886_p6 = pneg %p2885_p1 }
  0x2f   : > { %p2891_p3 = pnand %p2889_p10, %p2886_p6 }
  0x31   : > { %2894 = shalt.err (!%p2891_p3)
}
  0x32   : > { %s2895_s25 = scalar_lea.vmem %s3110_s28, 2048  ;;  %p2903_p12 = scmp.lt.s32.totalorder %s3110_s28, %s3110_s28 }
  0x33   : > { %p2896_p5 = scmp.ne.s32.totalorder %s3110_s28, %s2895_s25  ;;  %p2904_p0 = scmp.lt.s32.totalorder %s2895_s25, %s2895_s25 }
  0x35   : > { %p2898_p7 = pnand %p2896_p5, %p2856_p13  ;;  %p2905_p2 = por %p2904_p0, %p2903_p12 }
  0x37   : > { %p2899_p9 = pneg %p2898_p7 }
  0x39   : > { %p2906_p1 = pnand %p2905_p2, %p2899_p9 }
  0x3b   : > { %2909 = shalt.err (!%p2906_p1)
}
  0x3c   : > { %s3016_s7 = smov 128   ;;  %s3017_s8 = smov 8  }
  0x3d   : > { %2759 = dma.hbm_to_vmem [thread:$0]  (!%p3106_p11), %s3471_s2, 2048, %s3110_s28, [#allocation6], %s3016_s7, %s3016_s7, %s3017_s8  }
  0x3e   : > { %s3165_s11 = sadd.s32 1, %s3010_s18   ;;  %s28_s13 = sadd.s32 1, %s3006_s17 }
  0x3f   : > { %s25_s12 = ssub.s32 %s3010_s18, %s3165_s11  ;;  %p35_p6 = scmp.ne.s32.totalorder %s3006_s17, %s3002_s16 }
  0x40   : > { %p26_p13 = scmp.eq.s32.totalorder %s25_s12, 0  ;;  %p36_p10 = scmp.eq.s32.totalorder %s3010_s18, 0 }
  0x41   : > { %p3481_p5 = scmp.eq.s32.totalorder %s3076_s19, 1  ;;  %p2770_p9 = scmp.lt.s32.totalorder %s3010_s18, 2 }
  0x42   : > { %s3174_s14 = scalar_select %p26_p13, %s3006_s17, %s28_s13  }
  0x43   : > { %p37_p3 = por %p36_p10, %p35_p6  ;;  %p3178_p7 = por %p3481_p5, %p35_p6 }
  0x44   : > { %s183_s26 = sand.u32 1, %s3006_s17   ;;  %s2450_s28 = sshll.u32 %s3010_s18, 7 }
  0x45   : > { %s3482_s20 = scalar_select %p3178_p7, 1, 0 }
  0x46   : > { %s2449_s24 = sshll.u32 %s183_s26, 3  ;;  %s3188_s30 = scalar_lea.hbm %s3469_s0, %s2450_s28 }
  0x47   : > { %s187_s5 = scalar_lea.vmem [#allocation2], %s2449_s24  ;;  %p3192_p11 = pnand %p2770_p9, %p37_p3 }
  0x48   : > { %s194_s6 = sshll.u32 %s187_s5, 4  ;;  %s184_s7 = scalar_lea.sflag [#allocation3], %s183_s26  ;;  %s3190_s6 = int_to_ptr.vmem [resolvable:$true] %s194_s6 }
  0x49   : > { %s2910_s8 = scalar_lea.hbm %s3188_s30, 128  ;;  %p2912_p0 = pneg %p3192_p11 }
  0x4a   : > { %p2911_p12 = scmp.ne.s32.totalorder %s3188_s30, %s2910_s8  ;;  %s2915_s12 = scalar_lea.hbm %s3469_s0, 256 }
  0x4b   : > { %p2916_p13 = scmp.lt.u32.totalorder %s3188_s30, %s3469_s0  ;;  %p2917_p6 = scmp.lt.u32.totalorder %s2915_s12, %s2910_s8 }
  0x4c   : > { %p2913_p2 = pnand %p2912_p0, %p2911_p12  ;;  %p2919_p3 = scmp.lt.u32.totalorder %s2910_s8, %s3188_s30 }
  0x4d   : > { %p2918_p10 = por %p2917_p6, %p2916_p13 }
  0x4e   : > { %p2914_p1 = pneg %p2913_p2 }
  0x4f   : > { %p2920_p5 = por %p2919_p3, %p2918_p10 }
  0x51   : > { %p2921_p9 = pnand %p2920_p5, %p2914_p1 }
  0x53   : > { %2924 = shalt.err (!%p2921_p9)
}
  0x54   : > { %s2925_s26 = scalar_lea.vmem %s3190_s6, 128  ;;  %s3018_s28 = smov [#allocation2]  }
  0x55   : > { %p2926_p12 = scmp.ne.s32.totalorder %s3190_s6, %s2925_s26  ;;  %s2930_s27 = sshll.u32 %s3018_s28, 4  ;;  %s2931_s27 = int_to_ptr.vmem [resolvable:$false] %s2930_s27 }
  0x56   : > { %s2932_s29 = scalar_lea.vmem %s2931_s27, 256  ;;  %p2933_p4 = scmp.lt.s32.totalorder %s3190_s6, %s2931_s27 }
  0x57   : > { %p2928_p2 = pnand %p2926_p12, %p2912_p0  ;;  %p2934_p13 = scmp.lt.s32.totalorder %s2932_s29, %s2925_s26 }
  0x59   : > { %p2929_p7 = pneg %p2928_p2  ;;  %p2935_p6 = por %p2934_p13, %p2933_p4 }
  0x5b   : > { %p2936_p10 = pnand %p2935_p6, %p2929_p7 }
  0x5d   : > { %2939 = shalt.err (!%p2936_p10)
}
  0x5e   : > { %2763 = dma.hbm_to_vmem [thread:$0]  (!%p3192_p11), %s3188_s30, 128, %s3190_s6, %s184_s7  }
  0x5f   : > { %203 = sbr.rel (%p3095_p8) target bundleno = 4823 (0x12d7), region = 36  ;;  %s3224_s5 = sand.u32 (!%p3095_p8), 1, %s3002_s16  }
  0x60   : > { %s2452_s8 = sshll.u32 (!%p3095_p8), %s3224_s5, 3  ;;  %s206_s9 = scalar_lea.sflag (!%p3095_p8), [#allocation3], %s3224_s5 }
  0x61   : > { %s209_s10 = scalar_lea.vmem (!%p3095_p8), [#allocation2], %s2452_s8  ;;  %p3484_p4 = scmp.ne.s32.totalorder (!%p3095_p8), %s3477_s21, 0 }
  0x66   : > { %2985 = dma.done.wait (%p3484_p4), %s206_s9, 128  }
  0x67   : > { %2987 = vsyncadd (%p3484_p4), %s206_s9, 4294967168  ;;  %p3485_p7 = scmp.eq.s32.totalorder %s3076_s19, 0 }
  0x69   : > { %2989 = dma.done.wait (%p3485_p7), [#allocation6], 3584   ;;  %p3486_p8 = pmov %p3485_p7 }
  0x6a   : > { %v3019_v0 = vmov 0.0   ;;  %v244_v1 = vld [vmem:[#allocation5 + $0x8] sm:$0xff]  ;;  %v247_v2 = vld [vmem:[#allocation5 + $0x20] sm:$0xff]  ;;  %v246_v5 = vld [vmem:[#allocation5 + $0x18] sm:$0xff]  ;;  %vm255_vm0 = vcmask 261120   ;;  %vm3020_vm1 = vmmov 0  }
  0x6b   : > { %2991 = vsyncadd (%p3486_p8), [#allocation6], 4294963712  ;;  %323 = vmatprep.mubr.f32.mxu0 %v3019_v0  ;;  %v243_v3 = vld [vmem:[#allocation5] sm:$0xff]  ;;  %v2703_v4 = vpack.c.bf16 %v247_v2, %v244_v1  ;;  %v250_v6 = vld [vmem:[#allocation5 + $0x38] sm:$0xff]  ;;  %2564 = vmatprep.mubr.msk.f32.mxu1 %vm3020_vm1, %v3019_v0  ;;  %v3021_v17 = vmov 0.0|0.0   ;;  %vm416_vm2 = vcmask 130048  }
  0x6c   : > { %v253_v7 = vld [vmem:[#allocation5 + $0x50] sm:$0xff]  ;;  %v2705_v8 = vpack.c.bf16 %v246_v5, %v243_v3  ;;  %v252_v11 = vld [vmem:[#allocation5 + $0x48] sm:$0xff]  ;;  %v251_v16 = vld [vmem:[#allocation5 + $0x40] sm:$0xff]  ;;  %2711 = vmatprep.subr.bf16.mxu1 %v3021_v17  ;;  %s3022_s21 = smov 112   ;;  %vm494_vm3 = vcmask 64512   ;;  %s3023_s23 = smov 96  }
  0x6d   : > { %v2707_v9 = vpack.c.bf16 %v253_v7, %v250_v6  ;;  %v249_v10 = vld [vmem:[#allocation5 + $0x30] sm:$0xff]  ;;  %2704 = vmatprep.subr.bf16.mxu0 %v2703_v4  ;;  %v248_v15 = vld [vmem:[#allocation5 + $0x28] sm:$0xff]  ;;  %v254_v19 = vld [vmem:[#allocation5 + $0x58] sm:$0xff]  ;;  %s3024_s30 = smov 80   ;;  %s3025_s6 = smov 64  }
  0x6e   : > { %2706 = vmatpush1.bf16.msra.mxu0 %v2705_v8  ;;  %v2709_v12 = vpack.c.bf16 %v252_v11, %v249_v10  ;;  %v242_v13 = vld [vmem:[%s209_s10] sm:$0xff]  ;;  %v2715_v20 = vpack.c.bf16 %v254_v19, %v251_v16  ;;  %v400_v53 = vld [vmem:[#allocation7] sm:$0xff]  ;;  %v401_v54 = vld [vmem:[#allocation7 + $0x8] sm:$0xff]  ;;  %s3026_s25 = smov 48   ;;  %s3027_s7 = smov 32  }
  0x6f   : > { %2708 = vmatprep.subr.bf16.mxu0 %v2707_v9  ;;  %v245_v14 = vld [vmem:[#allocation5 + $0x10] sm:$0xff]  ;;  %v403_v49 = vld [vmem:[#allocation7 + $0x18] sm:$0xff]  ;;  %v2721_v56 = vpack.c.bf16 %v401_v54, %v400_v53  ;;  %v404_v16 = vld [vmem:[#allocation7 + $0x20] sm:$0xff]  ;;  %s3028_s12 = smov 16   ;;  %s2492_s26 = sshll.u32 %s3076_s19, 7 }
  0x70   : > { %v2712_v18 = vpack.c.bf16 %v248_v15, %v245_v14  ;;  %v402_v48 = vld [vmem:[#allocation7 + $0x10] sm:$0xff]  ;;  %s241_s28 = scalar_lea.vmem [#allocation8], %s2452_s8  ;;  %s3425_s10 = scalar_lea.hbm %s3473_s4, %s2492_s26 }
  0x71   : > { %v2718_v50 = vpack.c.bf16 %v403_v49, %v402_v48  ;;  %s2355_s27 = sshll.u32 %s241_s28, 4  ;;  %p3487_p0 = scmp.ne.s32.totalorder %s3482_s20, 0  ;;  %s3427_s27 = int_to_ptr.vmem [resolvable:$true] %s2355_s27 }
  0x72   : > { %2710 = vmatpush1.bf16.msra.mxu0 %v2709_v12  ;;  %2713 = vmatpush3.bf16.msra.mxu1 %v2712_v18  ;;  %v405_v18 = vld [vmem:[#allocation7 + $0x28] sm:$0xff]  ;;  %s3029_s19 = smov [#allocation8]  }
  0x73   : > { %2567 = vmatprep.subr.mxu0 %v3019_v0  ;;  %2714 = vmatprep.subr.bf16.mxu1 %v3021_v17  ;;  %v2724_v19 = vpack.c.bf16 %v405_v18, %v404_v16  ;;  %s2944_s8 = sshll.u32 %s3029_s19, 4  ;;  %s2945_s8 = int_to_ptr.vmem [resolvable:$false] %s2944_s8 }
  0x74   : > { %p2947_p5 = scmp.lt.s32.totalorder %s3427_s27, %s2945_s8 }
  0x75   : > { %2456 = vmatmul.mubr.msk.f32.vlgmr.msra.gmra.mrb[0].mxu0 %vm255_vm0, %v242_v13 }
  0x76   : > { %2569 = vmatprep.mubr.msk.f32.mxu0 %vm3020_vm1, %v3019_v0  ;;  %2716 = vmatpush3.bf16.msra.mxu1 %v2715_v20 }
  0x77   : > { %2572 = vmatprep.subr.mxu1 %v3019_v0 }
  0x79   : > { %2565 = vmatmul.mubr.msk.f32.vlgmr.msra.gmra.mrb[0].mxu1 %vm255_vm0, %v242_v13 }
  0x7a   : > { %2574 = vmatprep.mubr.msk.f32.mxu1 %vm3020_vm1, %v3019_v0 }
 0x148   : > { %v3247_v21 = vpop.f32.mrb[0].mxu0 }
 0x149   : > { %v3249_v22 = vpop.f32.mrb[1].mxu0 }
 0x14a   : > { %581 = vrot.lane.b32.xlu0 %v3249_v22, %s3022_s21  ;;  %2568 = vmatpush3.xpose.msk.msra.mxu0 %vm416_vm2, %v3249_v22 }
 0x14b   : > { %2577 = vmatprep.subr.mxu0 %v3019_v0 }
 0x14c   : > { %v3272_v29 = vpop.f32.mrb[0].mxu1 }
 0x14d   : > { %2570 = vmatmul.mubr.msk.f32.vlgmr.msra.gmra.mrb[2].mxu0 %vm416_vm2, %v3247_v21  ;;  %v2566_v30 = vpop.f32.mrb[1].mxu1  ;;  %2573 = vmatpush3.msra.mxu1 %v3272_v29 }
 0x14e   : > { %579 = vrot.lane.b32.xlu0 %v3247_v21, %s3022_s21  ;;  %2579 = vmatprep.mubr.msk.f32.mxu0 %vm3020_vm1, %v3019_v0 }
 0x14f   : > { %2582 = vmatprep.subr.mxu1 %v3019_v0 }
 0x1bc   : > { %v582_v23 = vpop.permute.xlu0 %581 }
 0x1bd   : > { %2578 = vmatpush3.xpose.msk.msra.mxu0 %vm416_vm2, %v582_v23 }
 0x1be   : > { %2717 = vmatprep.subr.bf16.mxu0 %v3021_v17 }
 0x1c0   : > { %v580_v24 = vpop.permute.xlu0 %579 }
 0x1c1   : > { %2580 = vmatmul.mubr.msk.f32.vlgmr.msra.gmra.mrb[4].mxu0 %vm416_vm2, %v580_v24 }
 0x1c2   : > { %2591 = vmatprep.mubr.msk.f32.mxu0 %vm3020_vm1, %v3019_v0  ;;  %2719 = vmatpush3.bf16.msra.mxu0 %v2718_v50 }
 0x1c3   : > { %2601 = vmatprep.subr.mxu0 %v3019_v0 }
 0x220   : > { %v489_v25 = vpop.f32.mrb[2].mxu0 }
 0x221   : > { %v493_v26 = vmul.f32 0.25, %v489_v25  ;;  %v2571_v27 = vpop.f32.mrb[3].mxu0 }
 0x223   : > { %v495_v28 = vsel %vm494_vm3, %v493_v26, -inf }
 0x224   : > { %496 = vmax.xlane.f32.xlu1 %v495_v28 }
 0x294   : > { %v653_v31 = vpop.f32.mrb[4].mxu0 }
 0x295   : > { %v657_v32 = vmul.f32 0.25, %v653_v31  ;;  %v2581_v33 = vpop.f32.mrb[5].mxu0 }
 0x297   : > { %v658_v34 = vsel %vm494_vm3, %v657_v32, -inf }
 0x298   : > { %659 = vmax.xlane.f32.xlu1 %v658_v34 }
 0x2b1   : > { %v497_v35 = vpop.xlane.xlu1 %496 }
 0x2b2   : > { %v498_v36 = vsub.f32 %v493_v26, %v497_v35 }
 0x2b4   : > { %v499_v37 = vmul.f32 1.442695, %v498_v36 }
 0x2b6   : > { %2822 = vpow2.f32 %v499_v37 }
 0x2c0   : > { %v2823_v38 = vpop.eup %2822 }
 0x2c1   : > { %v501_v39 = vsel %vm494_vm3, %v2823_v38, 0.0 }
 0x2c2   : > { %502 = vadd.xlane.f32.xlu0 %v501_v39 }
 0x2d8   : > { %982 = vrot.lane.b32.xlu0 %v3272_v29, %s3023_s23 }
 0x2dc   : > { %1134 = vrot.lane.b32.xlu0 %v3249_v22, %s3024_s30 }
 0x325   : > { %v660_v40 = vpop.xlane.xlu1 %659 }
 0x326   : > { %v661_v41 = vsub.f32 %v657_v32, %v660_v40  ;;  %v406_v40 = vld [vmem:[#allocation7 + $0x30] sm:$0xff] }
 0x328   : > { %v662_v42 = vmul.f32 1.442695, %v661_v41  ;;  %v407_v41 = vld [vmem:[#allocation7 + $0x38] sm:$0xff] }
 0x32a   : > { %2824 = vpow2.f32 %v662_v42  ;;  %v2727_v42 = vpack.c.bf16 %v407_v41, %v406_v40 }
 0x334   : > { %v2825_v43 = vpop.eup %2824 }
 0x335   : > { %v664_v44 = vsel %vm494_vm3, %v2825_v43, 0.0 }
 0x336   : > { %665 = vadd.xlane.f32.xlu1 %v664_v44 }
 0x347   : > { %670 = vrot.lane.b32.xlu1 %v3272_v29, %s3022_s21  ;;  %s2342_s21 = scalar_lea.sflag [#allocation4], %s3224_s5 }
 0x34b   : > { %894 = vrot.lane.b32.xlu1 %v3249_v22, %s3023_s23 }
 0x34f   : > { %v503_v45 = vpop.xlane.xlu0 %502  ;;  %892 = vrot.lane.b32.xlu1 %v3247_v21, %s3023_s23  ;;  %s2940_s23 = scalar_lea.vmem %s3427_s27, 128 }
 0x350   : > { %2826 = vrcp.f32 %v503_v45  ;;  %p2941_p11 = scmp.ne.s32.totalorder %s3427_s27, %s2940_s23 }
 0x352   : > { %p2942_p1 = pnand %p2941_p11, %p3487_p0 }
 0x353   : > { %v983_v59 = vpop.permute.xlu0 %982 }
 0x354   : > { %p2943_p3 = pneg %p2942_p1 }
 0x357   : > { %v1135_v20 = vpop.permute.xlu0 %1134 }
 0x35a   : > { %v2827_v46 = vpop.eup %2826 }
 0x35b   : > { %v505_v47 = vmul.f32 %v2827_v46, %v2823_v38 }
 0x35d   : > { %2575 = vmatmul.mubr.msk.f32.vlgmr.msra.gmra.mrb[2].mxu1 %vm494_vm3, %v505_v47 }
 0x35e   : > { %2584 = vmatprep.mubr.msk.f32.mxu1 %vm3020_vm1, %v3019_v0 }
 0x3c3   : > { %v666_v51 = vpop.xlane.xlu1 %665 }
 0x3c4   : > { %2828 = vrcp.f32 %v666_v51 }
 0x3c7   : > { %v671_v52 = vpop.permute.xlu1 %670 }
 0x3c8   : > { %2583 = vmatpush3.msra.mxu1 %v671_v52 }
 0x3c9   : > { %2720 = vmatprep.subr.bf16.mxu1 %v3021_v17 }
 0x3cb   : > { %v895_v61 = vpop.permute.xlu1 %894 }
 0x3ce   : > { %v2829_v55 = vpop.eup %2828 }
 0x3cf   : > { %v668_v57 = vmul.f32 %v2829_v55, %v2825_v43  ;;  %v893_v1 = vpop.permute.xlu1 %892 }
 0x3d1   : > { %2585 = vmatmul.mubr.msk.f32.vlgmr.msra.gmra.mrb[4].mxu1 %vm494_vm3, %v668_v57 }
 0x3d2   : > { %2722 = vmatpush3.bf16.msra.mxu1 %v2721_v56  ;;  %2598 = vmatprep.mubr.msk.f32.mxu1 %vm3020_vm1, %v3019_v0 }
 0x3d3   : > { %2606 = vmatprep.subr.mxu1 %v3019_v0 }
 0x430   : > { %v575_v58 = vpop.f32.mrb[2].mxu1 }
 0x431   : > { %v2576_v60 = vpop.f32.mrb[3].mxu1  ;;  %2599 = vmatmul.mubr.msk.f32.vlgmr.msra.gmra.mrb[6].mxu1 %vm416_vm2, %v575_v58 }
 0x432   : > { %2607 = vmatpush3.msra.mxu1 %v983_v59  ;;  %2608 = vmatprep.mubr.msk.f32.mxu1 %vm3020_vm1, %v3019_v0 }
 0x433   : > { %2618 = vmatprep.subr.mxu1 %v3019_v0 }
 0x4a4   : > { %v742_v62 = vpop.f32.mrb[4].mxu1 }
 0x4a5   : > { %v2586_v63 = vpop.f32.mrb[5].mxu1  ;;  %2592 = vmatmul.mubr.msk.f32.vlgmr.msra.gmra.mrb[6].mxu0 %vm416_vm2, %v742_v62 }
 0x4a6   : > { %2602 = vmatpush3.xpose.msk.msra.mxu0 %vm416_vm2, %v895_v61  ;;  %2603 = vmatprep.mubr.msk.f32.mxu0 %vm3020_vm1, %v3019_v0  ;;  %v408_v63 = vld [vmem:[#allocation7 + $0x40] sm:$0xff] }
 0x4a7   : > { %2723 = vmatprep.subr.bf16.mxu0 %v3021_v17 }
 0x4a9   : > { %2604 = vmatmul.mubr.msk.f32.vlgmr.msra.gmra.mrb[8].mxu0 %vm416_vm2, %v893_v1  ;;  %v409_v1 = vld [vmem:[#allocation7 + $0x48] sm:$0xff] }
 0x4aa   : > { %2615 = vmatprep.mubr.msk.f32.mxu0 %vm3020_vm1, %v3019_v0  ;;  %2725 = vmatpush3.bf16.msra.mxu0 %v2724_v19 }
 0x4ab   : > { %2623 = vmatprep.subr.mxu0 %v3019_v0 }
 0x504   : > { %v888_v2 = vpop.f32.mrb[6].mxu1 }
 0x505   : > { %v2600_v3 = vpop.f32.mrb[7].mxu1 }
 0x578   : > { %v815_v4 = vpop.f32.mrb[6].mxu0 }
 0x579   : > { %v3307_v5 = vadd.f32 %v888_v2, %v815_v4  ;;  %v2593_v6 = vpop.f32.mrb[7].mxu0  ;;  %v2730_v2 = vpack.c.bf16 %v409_v1, %v408_v63 }
 0x57c   : > { %v966_v7 = vpop.f32.mrb[8].mxu0 }
 0x57d   : > { %v970_v8 = vmul.f32 0.25, %v966_v7  ;;  %v2605_v9 = vpop.f32.mrb[9].mxu0 }
 0x57f   : > { %v971_v10 = vsel %vm494_vm3, %v970_v8, -inf }
 0x580   : > { %972 = vmax.xlane.f32.xlu1 %v971_v10 }
 0x591   : > { %1222 = vrot.lane.b32.xlu1 %v3272_v29, %s3024_s30 }
 0x595   : > { %1374 = vrot.lane.b32.xlu1 %v3249_v22, %s3025_s6 }
 0x60d   : > { %v973_v11 = vpop.xlane.xlu1 %972 }
 0x60e   : > { %v974_v12 = vsub.f32 %v970_v8, %v973_v11 }
 0x610   : > { %v975_v13 = vmul.f32 1.442695, %v974_v12 }
 0x611   : > { %v1223_v28 = vpop.permute.xlu1 %1222 }
 0x612   : > { %2830 = vpow2.f32 %v975_v13 }
 0x615   : > { %v1375_v46 = vpop.permute.xlu1 %1374 }
 0x61c   : > { %v2831_v14 = vpop.eup %2830 }
 0x61d   : > { %v977_v15 = vsel %vm494_vm3, %v2831_v14, 0.0 }
 0x61e   : > { %978 = vadd.xlane.f32.xlu0 %v977_v15 }
 0x634   : > { %1132 = vrot.lane.b32.xlu0 %v3247_v21, %s3024_s30  ;;  %s2946_s30 = scalar_lea.vmem %s2945_s8, 256 }
 0x635   : > { %p2948_p9 = scmp.lt.s32.totalorder %s2946_s30, %s2940_s23 }
 0x637   : > { %p2949_p12 = por %p2948_p9, %p2947_p5 }
 0x639   : > { %p2950_p2 = pnand %p2949_p12, %p2943_p3 }
 0x6ab   : > { %v979_v23 = vpop.xlane.xlu0 %978 }
 0x6ac   : > { %2832 = vrcp.f32 %v979_v23 }
 0x6af   : > { %v1133_v26 = vpop.permute.xlu0 %1132 }
 0x6b6   : > { %v2833_v24 = vpop.eup %2832 }
 0x6b7   : > { %v981_v25 = vmul.f32 %v2833_v24, %v2831_v14 }
 0x6b9   : > { %2609 = vmatmul.mubr.msk.f32.vlgmr.msra.gmra.mrb[8].mxu1 %vm494_vm3, %v981_v25 }
 0x6ba   : > { %2619 = vmatpush3.xpose.msk.msra.mxu1 %vm416_vm2, %v1135_v20  ;;  %2620 = vmatprep.mubr.msk.f32.mxu1 %vm3020_vm1, %v3019_v0 }
 0x6bb   : > { %2726 = vmatprep.subr.bf16.mxu1 %v3021_v17 }
 0x6bd   : > { %2621 = vmatmul.mubr.msk.f32.vlgmr.msra.gmra.mrb[10].mxu1 %vm416_vm2, %v1133_v26  ;;  %v410_v26 = vld [vmem:[#allocation7 + $0x50] sm:$0xff] }
 0x6be   : > { %2632 = vmatprep.mubr.msk.f32.mxu1 %vm3020_vm1, %v3019_v0  ;;  %2728 = vmatpush3.bf16.msra.mxu1 %v2727_v42 }
 0x6bf   : > { %2640 = vmatprep.subr.mxu1 %v3019_v0 }
 0x78c   : > { %v1054_v27 = vpop.f32.mrb[8].mxu1 }
 0x78d   : > { %v2610_v30 = vpop.f32.mrb[9].mxu1  ;;  %2616 = vmatmul.mubr.msk.f32.vlgmr.msra.gmra.mrb[10].mxu0 %vm416_vm2, %v1054_v27  ;;  %v411_v27 = vld [vmem:[#allocation7 + $0x58] sm:$0xff] }
 0x78e   : > { %2624 = vmatpush3.msra.mxu0 %v1223_v28  ;;  %2625 = vmatprep.mubr.msk.f32.mxu0 %vm3020_vm1, %v3019_v0  ;;  %v2733_v28 = vpack.c.bf16 %v411_v27, %v410_v26 }
 0x78f   : > { %2635 = vmatprep.subr.mxu0 %v3019_v0 }
 0x790   : > { %v1206_v31 = vpop.f32.mrb[10].mxu1 }
 0x791   : > { %v1210_v32 = vmul.f32 0.25, %v1206_v31  ;;  %v2622_v33 = vpop.f32.mrb[11].mxu1 }
 0x793   : > { %v1211_v34 = vsel %vm494_vm3, %v1210_v32, -inf }
 0x794   : > { %1212 = vmax.xlane.f32.xlu0 %v1211_v34 }
 0x7aa   : > { %1462 = vrot.lane.b32.xlu0 %v3272_v29, %s3025_s6 }
 0x7ae   : > { %1614 = vrot.lane.b32.xlu0 %v3249_v22, %s3026_s25 }
 0x821   : > { %v1213_v35 = vpop.xlane.xlu0 %1212 }
 0x822   : > { %v1214_v36 = vsub.f32 %v1210_v32, %v1213_v35 }
 0x824   : > { %v1215_v37 = vmul.f32 1.442695, %v1214_v36 }
 0x825   : > { %v1463_v52 = vpop.permute.xlu0 %1462 }
 0x826   : > { %2834 = vpow2.f32 %v1215_v37 }
 0x829   : > { %v1615_v6 = vpop.permute.xlu0 %1614 }
 0x830   : > { %v2835_v38 = vpop.eup %2834 }
 0x831   : > { %v1217_v39 = vsel %vm494_vm3, %v2835_v38, 0.0 }
 0x832   : > { %1218 = vadd.xlane.f32.xlu1 %v1217_v39 }
 0x843   : > { %1372 = vrot.lane.b32.xlu1 %v3247_v21, %s3025_s6 }
 0x860   : > { %v1127_v43 = vpop.f32.mrb[10].mxu0 }
 0x861   : > { %v1131_v44 = vadd.f32 %v1127_v43, %v3307_v5  ;;  %v2617_v45 = vpop.f32.mrb[11].mxu0 }
 0x8bf   : > { %v1219_v47 = vpop.xlane.xlu1 %1218 }
 0x8c0   : > { %2836 = vrcp.f32 %v1219_v47 }
 0x8c3   : > { %v1373_v50 = vpop.permute.xlu1 %1372 }
 0x8ca   : > { %v2837_v48 = vpop.eup %2836 }
 0x8cb   : > { %v1221_v49 = vmul.f32 %v2837_v48, %v2835_v38 }
 0x8cd   : > { %2626 = vmatmul.mubr.msk.f32.vlgmr.msra.gmra.mrb[12].mxu0 %vm494_vm3, %v1221_v49  ;;  %v412_v49 = vld [vmem:[#allocation7 + $0x60] sm:$0xff] }
 0x8ce   : > { %2636 = vmatpush3.xpose.msk.msra.mxu0 %vm416_vm2, %v1375_v46  ;;  %2637 = vmatprep.mubr.msk.f32.mxu0 %vm3020_vm1, %v3019_v0 }
 0x8cf   : > { %2729 = vmatprep.subr.bf16.mxu0 %v3021_v17 }
 0x8d1   : > { %2638 = vmatmul.mubr.msk.f32.vlgmr.msra.gmra.mrb[14].mxu0 %vm416_vm2, %v1373_v50  ;;  %v413_v50 = vld [vmem:[#allocation7 + $0x68] sm:$0xff] }
 0x8d2   : > { %2649 = vmatprep.mubr.msk.f32.mxu0 %vm3020_vm1, %v3019_v0  ;;  %2731 = vmatpush3.bf16.msra.mxu0 %v2730_v2 }
 0x8d3   : > { %2657 = vmatprep.subr.mxu0 %v3019_v0 }
 0x9a0   : > { %v1294_v51 = vpop.f32.mrb[12].mxu0 }
 0x9a1   : > { %v2627_v53 = vpop.f32.mrb[13].mxu0  ;;  %2633 = vmatmul.mubr.msk.f32.vlgmr.msra.gmra.mrb[12].mxu1 %vm416_vm2, %v1294_v51  ;;  %v2736_v51 = vpack.c.bf16 %v413_v50, %v412_v49 }
 0x9a2   : > { %2641 = vmatpush3.msra.mxu1 %v1463_v52  ;;  %2642 = vmatprep.mubr.msk.f32.mxu1 %vm3020_vm1, %v3019_v0 }
 0x9a3   : > { %2652 = vmatprep.subr.mxu1 %v3019_v0 }
 0x9a4   : > { %v1446_v54 = vpop.f32.mrb[14].mxu0 }
 0x9a5   : > { %v1450_v55 = vmul.f32 0.25, %v1446_v54  ;;  %v2639_v56 = vpop.f32.mrb[15].mxu0 }
 0x9a7   : > { %v1451_v57 = vsel %vm494_vm3, %v1450_v55, -inf }
 0x9a8   : > { %1452 = vmax.xlane.f32.xlu1 %v1451_v57 }
 0x9b9   : > { %1702 = vrot.lane.b32.xlu1 %v3272_v29, %s3026_s25 }
 0x9bd   : > { %1854 = vrot.lane.b32.xlu1 %v3249_v22, %s3027_s7 }
 0xa35   : > { %v1453_v58 = vpop.xlane.xlu1 %1452 }
 0xa36   : > { %v1454_v59 = vsub.f32 %v1450_v55, %v1453_v58 }
 0xa38   : > { %v1455_v60 = vmul.f32 1.442695, %v1454_v59 }
 0xa39   : > { %v1703_v12 = vpop.permute.xlu1 %1702 }
 0xa3a   : > { %2838 = vpow2.f32 %v1455_v60 }
 0xa3d   : > { %v1855_v32 = vpop.permute.xlu1 %1854 }
 0xa44   : > { %v2839_v61 = vpop.eup %2838 }
 0xa45   : > { %v1457_v62 = vsel %vm494_vm3, %v2839_v61, 0.0 }
 0xa46   : > { %1458 = vadd.xlane.f32.xlu0 %v1457_v62 }
 0xa5c   : > { %1612 = vrot.lane.b32.xlu0 %v3247_v21, %s3026_s25 }
 0xa74   : > { %v1367_v3 = vpop.f32.mrb[12].mxu1 }
 0xa75   : > { %v1371_v4 = vadd.f32 %v1367_v3, %v1131_v44  ;;  %v2634_v5 = vpop.f32.mrb[13].mxu1 }
 0xad3   : > { %v1459_v7 = vpop.xlane.xlu0 %1458 }
 0xad4   : > { %2840 = vrcp.f32 %v1459_v7  ;;  %v415_v7 = vld [vmem:[#allocation7 + $0x78] sm:$0xff] }
 0xad7   : > { %v1613_v10 = vpop.permute.xlu0 %1612 }
 0xade   : > { %v2841_v8 = vpop.eup %2840 }
 0xadf   : > { %v1461_v9 = vmul.f32 %v2841_v8, %v2839_v61 }
 0xae1   : > { %2643 = vmatmul.mubr.msk.f32.vlgmr.msra.gmra.mrb[14].mxu1 %vm494_vm3, %v1461_v9 }
 0xae2   : > { %2653 = vmatpush3.xpose.msk.msra.mxu1 %vm416_vm2, %v1615_v6  ;;  %2654 = vmatprep.mubr.msk.f32.mxu1 %vm3020_vm1, %v3019_v0  ;;  %v414_v6 = vld [vmem:[#allocation7 + $0x70] sm:$0xff] }
 0xae3   : > { %2732 = vmatprep.subr.bf16.mxu1 %v3021_v17 }
 0xae5   : > { %2655 = vmatmul.mubr.msk.f32.vlgmr.msra.gmra.mrb[16].mxu1 %vm416_vm2, %v1613_v10 }
 0xae6   : > { %2666 = vmatprep.mubr.msk.f32.mxu1 %vm3020_vm1, %v3019_v0  ;;  %2734 = vmatpush3.bf16.msra.mxu1 %v2733_v28 }
 0xae7   : > { %2674 = vmatprep.subr.mxu1 %v3019_v0 }
 0xbb4   : > { %v1534_v11 = vpop.f32.mrb[14].mxu1 }
 0xbb5   : > { %v2644_v13 = vpop.f32.mrb[15].mxu1  ;;  %2650 = vmatmul.mubr.msk.f32.vlgmr.msra.gmra.mrb[16].mxu0 %vm416_vm2, %v1534_v11 }
 0xbb6   : > { %2658 = vmatpush3.msra.mxu0 %v1703_v12  ;;  %2659 = vmatprep.mubr.msk.f32.mxu0 %vm3020_vm1, %v3019_v0 }
 0xbb7   : > { %2669 = vmatprep.subr.mxu0 %v3019_v0 }
 0xbb8   : > { %v1686_v14 = vpop.f32.mrb[16].mxu1 }
 0xbb9   : > { %v1690_v15 = vmul.f32 0.25, %v1686_v14  ;;  %v2656_v16 = vpop.f32.mrb[17].mxu1 }
 0xbbb   : > { %v1691_v18 = vsel %vm494_vm3, %v1690_v15, -inf }
 0xbbc   : > { %1692 = vmax.xlane.f32.xlu0 %v1691_v18  ;;  %v2490_v18 = vld [vmem:[%s3472_s3] ss:$0 sm:$0xff] }
 0xbd2   : > { %1942 = vrot.lane.b32.xlu0 %v3272_v29, %s3027_s7 }
 0xbd6   : > { %2094 = vrot.lane.b32.xlu0 %v3249_v22, %s3028_s12 }
 0xc49   : > { %v1693_v19 = vpop.xlane.xlu0 %1692 }
 0xc4a   : > { %v1694_v20 = vsub.f32 %v1690_v15, %v1693_v19 }
 0xc4c   : > { %v1695_v23 = vmul.f32 1.442695, %v1694_v20 }
 0xc4d   : > { %v1943_v38 = vpop.permute.xlu0 %1942 }
 0xc4e   : > { %2842 = vpow2.f32 %v1695_v23 }
 0xc51   : > { %v2095_v55 = vpop.permute.xlu0 %2094 }
 0xc58   : > { %v2843_v24 = vpop.eup %2842 }
 0xc59   : > { %v1697_v25 = vsel %vm494_vm3, %v2843_v24, 0.0 }
 0xc5a   : > { %1698 = vadd.xlane.f32.xlu1 %v1697_v25 }
 0xc6b   : > { %1852 = vrot.lane.b32.xlu1 %v3247_v21, %s3027_s7 }
 0xc88   : > { %v1607_v30 = vpop.f32.mrb[16].mxu0 }
 0xc89   : > { %v1611_v31 = vadd.f32 %v1607_v30, %v1371_v4  ;;  %v2651_v22 = vpop.f32.mrb[17].mxu0 }
 0xce7   : > { %v1699_v33 = vpop.xlane.xlu1 %1698 }
 0xce8   : > { %2844 = vrcp.f32 %v1699_v33 }
 0xceb   : > { %v1853_v36 = vpop.permute.xlu1 %1852 }
 0xcf2   : > { %v2845_v34 = vpop.eup %2844 }
 0xcf3   : > { %v1701_v35 = vmul.f32 %v2845_v34, %v2843_v24 }
 0xcf5   : > { %2660 = vmatmul.mubr.msk.f32.vlgmr.msra.gmra.mrb[18].mxu0 %vm494_vm3, %v1701_v35 }
 0xcf6   : > { %2670 = vmatpush3.xpose.msk.msra.mxu0 %vm416_vm2, %v1855_v32  ;;  %2671 = vmatprep.mubr.msk.f32.mxu0 %vm3020_vm1, %v3019_v0 }
 0xcf7   : > { %2735 = vmatprep.subr.bf16.mxu0 %v3021_v17 }
 0xcf9   : > { %2672 = vmatmul.mubr.msk.f32.vlgmr.msra.gmra.mrb[20].mxu0 %vm416_vm2, %v1853_v36 }
 0xcfa   : > { %2683 = vmatprep.mubr.msk.f32.mxu0 %vm3020_vm1, %v3019_v0  ;;  %2737 = vmatpush3.bf16.msra.mxu0 %v2736_v51 }
 0xcfb   : > { %2691 = vmatprep.subr.mxu0 %v3019_v0 }
 0xdc8   : > { %v1774_v37 = vpop.f32.mrb[18].mxu0 }
 0xdc9   : > { %v2661_v39 = vpop.f32.mrb[19].mxu0  ;;  %2667 = vmatmul.mubr.msk.f32.vlgmr.msra.gmra.mrb[18].mxu1 %vm416_vm2, %v1774_v37 }
 0xdca   : > { %2675 = vmatpush3.msra.mxu1 %v1943_v38  ;;  %2676 = vmatprep.mubr.msk.f32.mxu1 %vm3020_vm1, %v3019_v0 }
 0xdcb   : > { %2686 = vmatprep.subr.mxu1 %v3019_v0 }
 0xdcc   : > { %v1926_v40 = vpop.f32.mrb[20].mxu0 }
 0xdcd   : > { %v1930_v41 = vmul.f32 0.25, %v1926_v40  ;;  %v2673_v42 = vpop.f32.mrb[21].mxu0 }
 0xdcf   : > { %v1931_v43 = vsel %vm494_vm3, %v1930_v41, -inf }
 0xdd0   : > { %1932 = vmax.xlane.f32.xlu1 %v1931_v43 }
 0xe5d   : > { %v1933_v44 = vpop.xlane.xlu1 %1932 }
 0xe5e   : > { %v1934_v45 = vsub.f32 %v1930_v41, %v1933_v44 }
 0xe60   : > { %v1935_v46 = vmul.f32 1.442695, %v1934_v45 }
 0xe62   : > { %2846 = vpow2.f32 %v1935_v46 }
 0xe6c   : > { %v2847_v47 = vpop.eup %2846 }
 0xe6d   : > { %v1937_v48 = vsel %vm494_vm3, %v2847_v47, 0.0 }
 0xe6e   : > { %1938 = vadd.xlane.f32.xlu0 %v1937_v48 }
 0xe84   : > { %2092 = vrot.lane.b32.xlu0 %v3247_v21, %s3028_s12 }
 0xe9c   : > { %v1847_v52 = vpop.f32.mrb[18].mxu1 }
 0xe9d   : > { %v1851_v53 = vadd.f32 %v1847_v52, %v1611_v31  ;;  %v2668_v54 = vpop.f32.mrb[19].mxu1 }
 0xefb   : > { %v1939_v56 = vpop.xlane.xlu0 %1938 }
 0xefc   : > { %2848 = vrcp.f32 %v1939_v56 }
 0xeff   : > { %v2093_v21 = vpop.permute.xlu0 %2092 }
 0xf06   : > { %v2849_v57 = vpop.eup %2848 }
 0xf07   : > { %v1941_v58 = vmul.f32 %v2849_v57, %v2847_v47 }
 0xf09   : > { %2677 = vmatmul.mubr.msk.f32.vlgmr.msra.gmra.mrb[20].mxu1 %vm494_vm3, %v1941_v58 }
 0xf0a   : > { %2687 = vmatpush3.xpose.msk.msra.mxu1 %vm416_vm2, %v2095_v55  ;;  %2688 = vmatprep.mubr.msk.f32.mxu1 %vm3020_vm1, %v3019_v0 }
 0xf0b   : > { %2738 = vmatprep.subr.bf16.mxu1 %v3021_v17 }
 0xf0d   : > { %2689 = vmatmul.mubr.msk.f32.vlgmr.msra.gmra.mrb[22].mxu1 %vm416_vm2, %v2093_v21 }
 0xf0e   : > { %2700 = vmatprep.mubr.msk.f32.mxu1 %vm3020_vm1, %v3019_v0 }
 0xfdc   : > { %v2014_v59 = vpop.f32.mrb[20].mxu1 }
 0xfdd   : > { %v2678_v60 = vpop.f32.mrb[21].mxu1  ;;  %2684 = vmatmul.mubr.msk.f32.vlgmr.msra.gmra.mrb[22].mxu0 %vm416_vm2, %v2014_v59 }
 0xfde   : > { %2693 = vmatprep.mubr.msk.f32.mxu0 %vm3020_vm1, %v3019_v0  ;;  %v2739_v0 = vpack.c.bf16 %v415_v7, %v414_v6 }
 0xfe0   : > { %v2166_v61 = vpop.f32.mrb[22].mxu1  ;;  %2740 = vmatpush3.bf16.msra.mxu1 %v2739_v0 }
 0xfe1   : > { %v2170_v62 = vmul.f32 0.25, %v2166_v61  ;;  %v2690_v63 = vpop.f32.mrb[23].mxu1 }
 0xfe3   : > { %v2171_v1 = vsel %vm494_vm3, %v2170_v62, -inf }
 0xfe4   : > { %2172 = vmax.xlane.f32.xlu0 %v2171_v1 }
0x1071   : > { %v2173_v17 = vpop.xlane.xlu0 %2172 }
0x1072   : > { %v2174_v2 = vsub.f32 %v2170_v62, %v2173_v17 }
0x1074   : > { %v2175_v3 = vmul.f32 1.442695, %v2174_v2 }
0x1076   : > { %2850 = vpow2.f32 %v2175_v3 }
0x1080   : > { %v2851_v4 = vpop.eup %2850 }
0x1081   : > { %v2177_v5 = vsel %vm494_vm3, %v2851_v4, 0.0 }
0x1082   : > { %2178 = vadd.xlane.f32.xlu1 %v2177_v5 }
0x1093   : > { %2182 = vrot.lane.b32.xlu1 %v3272_v29, %s3028_s12 }
0x10b0   : > { %v2087_v8 = vpop.f32.mrb[22].mxu0 }
0x10b1   : > { %v2091_v9 = vadd.f32 %v2087_v8, %v1851_v53  ;;  %v2685_v10 = vpop.f32.mrb[23].mxu0 }
0x110f   : > { %v2179_v11 = vpop.xlane.xlu1 %2178 }
0x1110   : > { %2852 = vrcp.f32 %v2179_v11 }
0x1113   : > { %v2183_v12 = vpop.permute.xlu1 %2182 }
0x1114   : > { %2692 = vmatpush3.msra.mxu0 %v2183_v12 }
0x111a   : > { %v2853_v13 = vpop.eup %2852 }
0x111b   : > { %v2181_v14 = vmul.f32 %v2853_v13, %v2851_v4 }
0x111d   : > { %2694 = vmatmul.mubr.msk.f32.vlgmr.msra.gmra.mrb[24].mxu0 %vm494_vm3, %v2181_v14 }
0x11f0   : > { %v2254_v15 = vpop.f32.mrb[24].mxu0 }
0x11f1   : > { %v2695_v29 = vpop.f32.mrb[25].mxu0  ;;  %2701 = vmatmul.mubr.msk.f32.vlgmr.msra.gmra.mrb[24].mxu1 %vm416_vm2, %v2254_v15 }
0x12c4   : > { %v2327_v16 = vpop.f32.mrb[24].mxu1 }
0x12c5   : > { %v2331_v19 = vadd.f32 %v2327_v16, %v2091_v9  ;;  %v2702_v20 = vpop.f32.mrb[25].mxu1 }
0x12c7   : > { %v2339_v23 = vadd.f32 %v2490_v18, %v2331_v19 }
0x12c9   : > { %2340 = vst [vmem:[%s241_s28] sm:$0xff] %v2339_v23 }
0x12ca   : > { %2953 = shalt.err (!%p2950_p2)
}
0x12cb   : > { %s2954_s5 = scalar_lea.hbm %s3425_s10, 128  ;;  %s2958_s7 = scalar_lea.hbm %s3473_s4, 256 }
0x12cc   : > { %p2955_p13 = scmp.ne.s32.totalorder %s3425_s10, %s2954_s5  ;;  %p2959_p4 = scmp.lt.u32.totalorder %s3425_s10, %s3473_s4 }
0x12cd   : > { %p2960_p7 = scmp.lt.u32.totalorder %s2958_s7, %s2954_s5  ;;  %p2962_p11 = scmp.lt.u32.totalorder %s2954_s5, %s3425_s10 }
0x12ce   : > { %p2956_p6 = pnand %p2955_p13, %p3487_p0 }
0x12cf   : > { %p2961_p8 = por %p2960_p7, %p2959_p4 }
0x12d0   : > { %p2957_p10 = pneg %p2956_p6 }
0x12d1   : > { %p2963_p1 = por %p2962_p11, %p2961_p8 }
0x12d3   : > { %p2964_p3 = pnand %p2963_p1, %p2957_p10 }
0x12d5   : > { %2967 = shalt.err (!%p2964_p3)
}
0x12d6   : > { %2751 = dma.vmem_to_hbm [thread:$0]  (%p3487_p0), %s3427_s27, 128, %s3425_s10, %s2342_s21  }
0x12d7 PF: > { %s2367_s24 = sand.u32 1, %s2998_s15   ;;  %p3488_p5 = scmp.ne.s32.totalorder %s3478_s22, 0 }
0x12d8   : > { %p3489_p9 = scmp.ge.s32.totalorder %s3010_s18, 2  ;;  %s2368_s26 = scalar_lea.sflag [#allocation4], %s2367_s24 }
0x12da   : > { %p2765_p12 = pnand %p3489_p9, %p3488_p5 }
0x12dc   : > { %2993 = dma.done.wait (!%p2765_p12), %s2368_s26, 128  }
0x12dd   : > { %2995 = vsyncadd (!%p2765_p12), %s2368_s26, 4294967168  ;;  %p18_p2 = scmp.ge.s32.totalorder %s3165_s11, 4   ;;  %s3490_s15 = smov %s3002_s16 }
0x12de   : > { %s3491_s16 = smov %s3006_s17  ;;  %s3492_s17 = smov %s3174_s14 }
0x12df   : > { %s3493_s18 = smov %s3165_s11  ;;  %20 = sbr.rel (!%p18_p2) target bundleno = 6 (0x6), region = 89 }
0x12e6   :  { %2373 = vsyncpa [#allocation3], 1 }
0x12e7   :  { %2375 = vsyncpa [#allocation3 + $0x1], 1 }
0x12e8   :  { %2376 = vsyncpa [#allocation6], 1 }
0x12e9   :  { %2377 = vsyncpa [#allocation4], 1 }
0x12ea   :  { %2379 = vsyncpa [#allocation4 + $0x1], 1 }

</bundles_post_ra>
